<compile_context>
chip_gen: v7x
topology: tpu7x:2x2x1
jax: 0.10.0
libtpu: 0.0.40
codegen_flags: <defaults>
</compile_context>

<pallas_src>
import math

import jax
import jax.numpy as jnp
from jax.experimental import pallas as pl
from jax.experimental.pallas import tpu as pltpu


# ---------------------------------------------------------------------------
# Pallas kernel: tb sessions per grid step, full GGNN propagation inside.
# ---------------------------------------------------------------------------
def make_ggnn_kernel(tb, N, H, step, matmul_dtype):
    def kernel(a_in_ref, a_out_ref, h0_ref,
               w_stack_ref, w_h_old_ref, b_stack_ref,
               out_ref):
        # Hoist weight / bias loads above the statically unrolled step loop.
        w_stack = w_stack_ref[...]        # (3H, 3H), matmul dtype
        w_h_old = w_h_old_ref[...]        # (H, H),   matmul dtype
        b_stack = b_stack_ref[...]        # (1, 3H),  f32 (implicit row broadcast)

        a_in = a_in_ref[...]              # (tb, N, N) f32
        a_out = a_out_ref[...]            # (tb, N, N) f32
        # (tb, N, H) -> (tb*N, H): N == 8 sublanes, so this is a no-op relayout.
        h = h0_ref[...].reshape(tb * N, H)

        for _ in range(step):             # static unroll over propagation steps
            h3 = h.reshape(tb, N, H)      # no-op relayout (see above)

            # --- VPU aggregation (keeps the MXU free for the fused gate matmul) ---
            # agg[b, n, :] = sum_m A[b, n, m] * h[b, m, :]
            h_m = h3[:, 0:1, :]                               # (tb, 1, H) sublane bcast
            agg_in = a_in[:, :, 0:1] * h_m                    # (tb, N, 1) lane bcast
            agg_out = a_out[:, :, 0:1] * h_m
            for m in range(1, N):
                h_m = h3[:, m:m + 1, :]
                agg_in = agg_in + a_in[:, :, m:m + 1] * h_m
                agg_out = agg_out + a_out[:, :, m:m + 1] * h_m
            agg_in = agg_in.reshape(tb * N, H)
            agg_out = agg_out.reshape(tb * N, H)

            # --- One fused gate matmul: X (tb*N, 3H) @ W_stack (3H, 3H) ---
            x = jnp.concatenate([agg_in, agg_out, h], axis=-1)
            pre = jnp.dot(x.astype(matmul_dtype), w_stack,
                          preferred_element_type=jnp.float32) + b_stack

            reset = jax.nn.sigmoid(pre[:, :H])
            update = jax.nn.sigmoid(pre[:, H:2 * H])
            h_cand = jnp.tanh(
                pre[:, 2 * H:]
                + jnp.dot((reset * h).astype(matmul_dtype), w_h_old,
                          preferred_element_type=jnp.float32))
            h = (1.0 - update) * h + update * h_cand

        out_ref[...] = h.reshape(tb, N, H)

    return kernel


# ---------------------------------------------------------------------------
# Fold edge projections + biases into one stacked (3H, 3H) gate weight.
# Exactly equivalent math up to fp rounding.
# ---------------------------------------------------------------------------
def _fuse_params(params, matmul_dtype):
    H = params["w_h_old"].shape[0]
    w_rzh = params["w_rzh_input"]                               # (2H, 3H)
    w_in_rzh = params["w_edge_in"] @ w_rzh[:H]                  # (H, 3H)
    w_out_rzh = params["w_edge_out"] @ w_rzh[H:2 * H]           # (H, 3H)
    b_rzh = (params["b_edge_in"] @ w_rzh[:H]
             + params["b_edge_out"] @ w_rzh[H:2 * H]
             + params["b_rzh_input"])                           # (1, 3H)
    # "old hidden" row block: [W_rz_old | 0]  (only r/z gates see h directly)
    w_old_rzh = jnp.concatenate(
        [params["w_rz_old"], jnp.zeros((H, H), jnp.float32)], axis=1)   # (H, 3H)
    w_stack = jnp.concatenate([w_in_rzh, w_out_rzh, w_old_rzh], axis=0)  # (3H, 3H)
    b_old = jnp.concatenate([params["b_rz_old"], params["b_h_old"]], axis=1)  # (1, 3H)
    b_stack = (b_rzh + b_old).astype(jnp.float32)               # (1, 3H)
    return (w_stack.astype(matmul_dtype),
            params["w_h_old"].astype(matmul_dtype),
            b_stack)


# ---------------------------------------------------------------------------
# GGNN propagation via pallas_call (batch-blocked grid).
# ---------------------------------------------------------------------------
def ggnn_forward(A, h0, params, step, block_b=512, matmul_dtype=jnp.bfloat16):
    """A: (B, N, 2N) in||out adjacency, h0: (B, N, H). Returns (B, N, H) float32."""
    B, N, H = h0.shape
    A = A.astype(jnp.float32)
    h0 = h0.astype(jnp.float32)

    # Pre-split adjacency in the wrapper (no in-kernel lane slicing of the 2N axis).
    a_in = A[:, :, :N]
    a_out = A[:, :, N:2 * N]

    tb = max(1, min(block_b, B))
    nb = pl.cdiv(B, tb)
    # Keep >=2 grid steps when the batch is big enough so a v7x megacore can shard
    # the (parallel) batch axis across its two TensorCores.
    if nb == 1 and B >= 16:
        tb = pl.cdiv(B, 2)
        nb = pl.cdiv(B, tb)
    Bp = nb * tb
    if Bp != B:
        pad = ((0, Bp - B), (0, 0), (0, 0))
        a_in = jnp.pad(a_in, pad)
        a_out = jnp.pad(a_out, pad)
        h0 = jnp.pad(h0, pad)

    w_stack, w_h_old, b_stack = _fuse_params(params, matmul_dtype)

    batch_spec = lambda shape: pl.BlockSpec(shape, lambda b: (b, 0, 0))
    const_spec = lambda shape: pl.BlockSpec(shape, lambda b: (0, 0))

    in_specs = [
        batch_spec((tb, N, N)),            # A_in
        batch_spec((tb, N, N)),            # A_out
        batch_spec((tb, N, H)),            # h0
        const_spec(w_stack.shape),         # stacked gate weights  (3H, 3H)
        const_spec(w_h_old.shape),         # candidate weight      (H, H)
        const_spec(b_stack.shape),         # fused biases          (1, 3H)
    ]

    wbytes = jnp.dtype(matmul_dtype).itemsize
    flops = step * Bp * N * (4 * N * H + 2 * 3 * H * 3 * H + 2 * H * H + 10 * H)
    transcendentals = step * 3 * Bp * N * H
    bytes_accessed = (4 * (2 * Bp * N * N + 2 * Bp * N * H)
                      + nb * (wbytes * 10 * H * H + 4 * 3 * H))

    out = pl.pallas_call(
        make_ggnn_kernel(tb, N, H, step, matmul_dtype),
        out_shape=jax.ShapeDtypeStruct((Bp, N, H), jnp.float32),
        grid=(nb,),
        in_specs=in_specs,
        out_specs=pl.BlockSpec((tb, N, H), lambda b: (b, 0, 0)),
        compiler_params=pltpu.CompilerParams(
            dimension_semantics=("parallel",)),   # v7x: consider pltpu.CORE_PARALLEL
        cost_estimate=pl.CostEstimate(
            flops=flops, transcendentals=transcendentals,
            bytes_accessed=bytes_accessed),
    )(a_in, a_out, h0, w_stack, w_h_old, b_stack)
    return out[:B]


# ---------------------------------------------------------------------------
# SR_GNN forward: embedding lookup + GGNN (Pallas) + per-sample sequence gather
# ---------------------------------------------------------------------------
def sr_gnn_forward(params, A, items, seq_alias, step=1, block_b=512,
                   matmul_dtype=jnp.bfloat16):
    h0 = jnp.take(params["embedding"], items, axis=0)                 # (B, N, H) glue
    h_items = ggnn_forward(A, h0, params, step, block_b=block_b,
                           matmul_dtype=matmul_dtype)                 # (B, N, H)
    h_seqs = jnp.take_along_axis(h_items, seq_alias[:, :, None], axis=1)  # (B, S, H)
    return h_seqs
# TODO(synk): SR_GNN.predict() head (fc1/fc2/fc3 attention + item scoring) is not part
# of forward() and is not implemented here.


# ---------------------------------------------------------------------------
# Pure-JAX reference of the same forward pass (unfused math, for correctness check)
# ---------------------------------------------------------------------------
def sr_gnn_forward_ref(params, A, items, seq_alias, step=1):
    h = jnp.take(params["embedding"], items, axis=0).astype(jnp.float32)
    N = A.shape[1]
    H = h.shape[-1]
    for _ in range(step):
        agg_in = jnp.matmul(A[:, :, :N], h)
        agg_out = jnp.matmul(A[:, :, N:2 * N], h)
        h_in = agg_in @ params["w_edge_in"] + params["b_edge_in"]
        h_out = agg_out @ params["w_edge_out"] + params["b_edge_out"]
        h_inputs = jnp.concatenate([h_in, h_out], axis=2)
        rzh = h_inputs @ params["w_rzh_input"] + params["b_rzh_input"]
        r_input, z_input, h_input = rzh[..., :H], rzh[..., H:2 * H], rzh[..., 2 * H:]
        rz = h @ params["w_rz_old"] + params["b_rz_old"]
        r_old, z_old = rz[..., :H], rz[..., H:]
        reset = jax.nn.sigmoid(r_old + r_input)
        update = jax.nn.sigmoid(z_old + z_input)
        h_cand = jnp.tanh(h_input + (reset * h) @ params["w_h_old"] + params["b_h_old"])
        h = (1.0 - update) * h + update * h_cand
    return jnp.take_along_axis(h, seq_alias[:, :, None], axis=1)


# ---------------------------------------------------------------------------
# Deterministic parameter init (mirrors nn.Module shapes; uniform(-1/sqrt(H), 1/sqrt(H)))
# ---------------------------------------------------------------------------
def init_params(key, num_item, hidden_size):
    std = 1.0 / math.sqrt(hidden_size)
    H = hidden_size

    def u(k, shape):
        return jax.random.uniform(k, shape, jnp.float32, minval=-std, maxval=std)

    ks = jax.random.split(key, 12)
    return {
        "embedding":    u(ks[0], (num_item + 1, H)),
        # Linear weights stored as (in, out); biases as (1, out)
        "w_edge_in":    u(ks[1], (H, H)),
        "b_edge_in":    u(ks[2], (1, H)),
        "w_edge_out":   u(ks[3], (H, H)),
        "b_edge_out":   u(ks[4], (1, H)),
        "w_rzh_input":  u(ks[5], (2 * H, 3 * H)),
        "b_rzh_input":  u(ks[6], (1, 3 * H)),
        "w_rz_old":     u(ks[7], (H, 2 * H)),
        "b_rz_old":     u(ks[8], (1, 2 * H)),
        "w_h_old":      u(ks[9], (H, H)),
        "b_h_old":      u(ks[10], (1, H)),
    }


if __name__ == "__main__":
    B, N, S, H = 2, 8, 8, 32   # batch, nodes/session, seq length, hidden
    num_item = 20
    step = 2

    key = jax.random.PRNGKey(0)
    k_par, k_A, k_items, k_alias = jax.random.split(key, 4)

    params = init_params(k_par, num_item, H)

    A = jax.random.uniform(k_A, (B, N, 2 * N), jnp.float32)          # in||out adjacency
    items = jax.random.randint(k_items, (B, N), 0, num_item + 1)     # node item ids
    seq_alias = jax.random.randint(k_alias, (B, S), 0, N)            # positions into nodes

    h_seqs_ref = sr_gnn_forward_ref(params, A, items, seq_alias, step=step)

    # f32 MXU-input variant (tight check of the fused structure).
    h_seqs_f32 = sr_gnn_forward(params, A, items, seq_alias, step=step,
                                matmul_dtype=jnp.float32)
    h_seqs_f32 = jax.block_until_ready(h_seqs_f32)
    assert h_seqs_f32.shape == (B, S, H)
    assert jnp.allclose(h_seqs_f32, h_seqs_ref, atol=5e-3, rtol=5e-3), \
        "f32 kernel mismatch vs JAX reference"

    # Default bf16 MXU-input variant (f32 accumulation; looser tolerance for rounding).
    h_seqs = sr_gnn_forward(params, A, items, seq_alias, step=step)
    h_seqs = jax.block_until_ready(h_seqs)
    assert h_seqs.shape == (B, S, H)
    assert jnp.allclose(h_seqs, h_seqs_ref, atol=3e-2, rtol=3e-2), \
        "bf16 kernel mismatch vs JAX reference"

    print("KERNEL_OK")
</pallas_src>

<mosaic_0001>
module attributes {stable_mosaic.version = 11 : i64} {
  func.func @kernel(%arg0: i32, %arg1: memref<2x8x8xf32, #tpu.memory_space<vmem>>, %arg2: memref<2x8x8xf32, #tpu.memory_space<vmem>>, %arg3: memref<2x8x32xf32, #tpu.memory_space<vmem>>, %arg4: memref<96x96xf32, #tpu.memory_space<vmem>>, %arg5: memref<32x32xf32, #tpu.memory_space<vmem>>, %arg6: memref<1x96xf32, #tpu.memory_space<vmem>>, %arg7: memref<2x8x32xf32, #tpu.memory_space<vmem>>) attributes {dimension_semantics = [#tpu.dimension_semantics<parallel>], iteration_bounds = array<i64: 1>, scalar_prefetch = 0 : i64, scratch_operands = 0 : i64, tpu.core_type = #tpu.core_type<tc>, window_params = [{transform_indices = @transform_0, window_bounds = array<i64: 2, 8, 8>}, {transform_indices = @transform_1, window_bounds = array<i64: 2, 8, 8>}, {transform_indices = @transform_2, window_bounds = array<i64: 2, 8, 32>}, {pipeline_mode = #tpu.pipeline_mode<synchronous>, transform_indices = @transform_3, window_bounds = array<i64: 96, 96>}, {pipeline_mode = #tpu.pipeline_mode<synchronous>, transform_indices = @transform_4, window_bounds = array<i64: 32, 32>}, {pipeline_mode = #tpu.pipeline_mode<synchronous>, transform_indices = @transform_5, window_bounds = array<i64: 1, 96>}, {transform_indices = @transform_6, window_bounds = array<i64: 2, 8, 32>}]} {
    %c0 = arith.constant 0 : index
    %c0_0 = arith.constant 0 : index
    %0 = vector.load %arg4[%c0, %c0_0] : memref<96x96xf32, #tpu.memory_space<vmem>>, vector<96x96xf32>
    %c0_1 = arith.constant 0 : index
    %c0_2 = arith.constant 0 : index
    %1 = vector.load %arg5[%c0_1, %c0_2] : memref<32x32xf32, #tpu.memory_space<vmem>>, vector<32x32xf32>
    %c0_3 = arith.constant 0 : index
    %c0_4 = arith.constant 0 : index
    %2 = vector.load %arg6[%c0_3, %c0_4] : memref<1x96xf32, #tpu.memory_space<vmem>>, vector<1x96xf32>
    %c0_5 = arith.constant 0 : index
    %c0_6 = arith.constant 0 : index
    %c0_7 = arith.constant 0 : index
    %3 = vector.load %arg1[%c0_5, %c0_6, %c0_7] : memref<2x8x8xf32, #tpu.memory_space<vmem>>, vector<2x8x8xf32>
    %c0_8 = arith.constant 0 : index
    %c0_9 = arith.constant 0 : index
    %c0_10 = arith.constant 0 : index
    %4 = vector.load %arg2[%c0_8, %c0_9, %c0_10] : memref<2x8x8xf32, #tpu.memory_space<vmem>>, vector<2x8x8xf32>
    %c0_11 = arith.constant 0 : index
    %c0_12 = arith.constant 0 : index
    %c0_13 = arith.constant 0 : index
    %5 = vector.load %arg3[%c0_11, %c0_12, %c0_13] : memref<2x8x32xf32, #tpu.memory_space<vmem>>, vector<2x8x32xf32>
    %6 = vector.shape_cast %5 : vector<2x8x32xf32> to vector<16x32xf32>
    %7 = vector.shape_cast %6 : vector<16x32xf32> to vector<2x8x32xf32>
    %8 = vector.extract_strided_slice %7 {offsets = [0, 0, 0], sizes = [2, 1, 32], strides = [1, 1, 1]} : vector<2x8x32xf32> to vector<2x1x32xf32>
    %9 = vector.extract_strided_slice %3 {offsets = [0, 0, 0], sizes = [2, 8, 1], strides = [1, 1, 1]} : vector<2x8x8xf32> to vector<2x8x1xf32>
    %10 = vector.broadcast %9 : vector<2x8x1xf32> to vector<2x8x32xf32>
    %11 = vector.broadcast %8 : vector<2x1x32xf32> to vector<2x8x32xf32>
    %12 = arith.mulf %10, %11 : vector<2x8x32xf32>
    %13 = vector.extract_strided_slice %4 {offsets = [0, 0, 0], sizes = [2, 8, 1], strides = [1, 1, 1]} : vector<2x8x8xf32> to vector<2x8x1xf32>
    %14 = vector.broadcast %13 : vector<2x8x1xf32> to vector<2x8x32xf32>
    %15 = vector.broadcast %8 : vector<2x1x32xf32> to vector<2x8x32xf32>
    %16 = arith.mulf %14, %15 : vector<2x8x32xf32>
    %17 = vector.extract_strided_slice %7 {offsets = [0, 1, 0], sizes = [2, 1, 32], strides = [1, 1, 1]} : vector<2x8x32xf32> to vector<2x1x32xf32>
    %18 = vector.extract_strided_slice %3 {offsets = [0, 0, 1], sizes = [2, 8, 1], strides = [1, 1, 1]} : vector<2x8x8xf32> to vector<2x8x1xf32>
    %19 = vector.broadcast %18 : vector<2x8x1xf32> to vector<2x8x32xf32>
    %20 = vector.broadcast %17 : vector<2x1x32xf32> to vector<2x8x32xf32>
    %21 = arith.mulf %19, %20 : vector<2x8x32xf32>
    %22 = arith.addf %12, %21 : vector<2x8x32xf32>
    %23 = vector.extract_strided_slice %4 {offsets = [0, 0, 1], sizes = [2, 8, 1], strides = [1, 1, 1]} : vector<2x8x8xf32> to vector<2x8x1xf32>
    %24 = vector.broadcast %23 : vector<2x8x1xf32> to vector<2x8x32xf32>
    %25 = vector.broadcast %17 : vector<2x1x32xf32> to vector<2x8x32xf32>
    %26 = arith.mulf %24, %25 : vector<2x8x32xf32>
    %27 = arith.addf %16, %26 : vector<2x8x32xf32>
    %28 = vector.extract_strided_slice %7 {offsets = [0, 2, 0], sizes = [2, 1, 32], strides = [1, 1, 1]} : vector<2x8x32xf32> to vector<2x1x32xf32>
    %29 = vector.extract_strided_slice %3 {offsets = [0, 0, 2], sizes = [2, 8, 1], strides = [1, 1, 1]} : vector<2x8x8xf32> to vector<2x8x1xf32>
    %30 = vector.broadcast %29 : vector<2x8x1xf32> to vector<2x8x32xf32>
    %31 = vector.broadcast %28 : vector<2x1x32xf32> to vector<2x8x32xf32>
    %32 = arith.mulf %30, %31 : vector<2x8x32xf32>
    %33 = arith.addf %22, %32 : vector<2x8x32xf32>
    %34 = vector.extract_strided_slice %4 {offsets = [0, 0, 2], sizes = [2, 8, 1], strides = [1, 1, 1]} : vector<2x8x8xf32> to vector<2x8x1xf32>
    %35 = vector.broadcast %34 : vector<2x8x1xf32> to vector<2x8x32xf32>
    %36 = vector.broadcast %28 : vector<2x1x32xf32> to vector<2x8x32xf32>
    %37 = arith.mulf %35, %36 : vector<2x8x32xf32>
    %38 = arith.addf %27, %37 : vector<2x8x32xf32>
    %39 = vector.extract_strided_slice %7 {offsets = [0, 3, 0], sizes = [2, 1, 32], strides = [1, 1, 1]} : vector<2x8x32xf32> to vector<2x1x32xf32>
    %40 = vector.extract_strided_slice %3 {offsets = [0, 0, 3], sizes = [2, 8, 1], strides = [1, 1, 1]} : vector<2x8x8xf32> to vector<2x8x1xf32>
    %41 = vector.broadcast %40 : vector<2x8x1xf32> to vector<2x8x32xf32>
    %42 = vector.broadcast %39 : vector<2x1x32xf32> to vector<2x8x32xf32>
    %43 = arith.mulf %41, %42 : vector<2x8x32xf32>
    %44 = arith.addf %33, %43 : vector<2x8x32xf32>
    %45 = vector.extract_strided_slice %4 {offsets = [0, 0, 3], sizes = [2, 8, 1], strides = [1, 1, 1]} : vector<2x8x8xf32> to vector<2x8x1xf32>
    %46 = vector.broadcast %45 : vector<2x8x1xf32> to vector<2x8x32xf32>
    %47 = vector.broadcast %39 : vector<2x1x32xf32> to vector<2x8x32xf32>
    %48 = arith.mulf %46, %47 : vector<2x8x32xf32>
    %49 = arith.addf %38, %48 : vector<2x8x32xf32>
    %50 = vector.extract_strided_slice %7 {offsets = [0, 4, 0], sizes = [2, 1, 32], strides = [1, 1, 1]} : vector<2x8x32xf32> to vector<2x1x32xf32>
    %51 = vector.extract_strided_slice %3 {offsets = [0, 0, 4], sizes = [2, 8, 1], strides = [1, 1, 1]} : vector<2x8x8xf32> to vector<2x8x1xf32>
    %52 = vector.broadcast %51 : vector<2x8x1xf32> to vector<2x8x32xf32>
    %53 = vector.broadcast %50 : vector<2x1x32xf32> to vector<2x8x32xf32>
    %54 = arith.mulf %52, %53 : vector<2x8x32xf32>
    %55 = arith.addf %44, %54 : vector<2x8x32xf32>
    %56 = vector.extract_strided_slice %4 {offsets = [0, 0, 4], sizes = [2, 8, 1], strides = [1, 1, 1]} : vector<2x8x8xf32> to vector<2x8x1xf32>
    %57 = vector.broadcast %56 : vector<2x8x1xf32> to vector<2x8x32xf32>
    %58 = vector.broadcast %50 : vector<2x1x32xf32> to vector<2x8x32xf32>
    %59 = arith.mulf %57, %58 : vector<2x8x32xf32>
    %60 = arith.addf %49, %59 : vector<2x8x32xf32>
    %61 = vector.extract_strided_slice %7 {offsets = [0, 5, 0], sizes = [2, 1, 32], strides = [1, 1, 1]} : vector<2x8x32xf32> to vector<2x1x32xf32>
    %62 = vector.extract_strided_slice %3 {offsets = [0, 0, 5], sizes = [2, 8, 1], strides = [1, 1, 1]} : vector<2x8x8xf32> to vector<2x8x1xf32>
    %63 = vector.broadcast %62 : vector<2x8x1xf32> to vector<2x8x32xf32>
    %64 = vector.broadcast %61 : vector<2x1x32xf32> to vector<2x8x32xf32>
    %65 = arith.mulf %63, %64 : vector<2x8x32xf32>
    %66 = arith.addf %55, %65 : vector<2x8x32xf32>
    %67 = vector.extract_strided_slice %4 {offsets = [0, 0, 5], sizes = [2, 8, 1], strides = [1, 1, 1]} : vector<2x8x8xf32> to vector<2x8x1xf32>
    %68 = vector.broadcast %67 : vector<2x8x1xf32> to vector<2x8x32xf32>
    %69 = vector.broadcast %61 : vector<2x1x32xf32> to vector<2x8x32xf32>
    %70 = arith.mulf %68, %69 : vector<2x8x32xf32>
    %71 = arith.addf %60, %70 : vector<2x8x32xf32>
    %72 = vector.extract_strided_slice %7 {offsets = [0, 6, 0], sizes = [2, 1, 32], strides = [1, 1, 1]} : vector<2x8x32xf32> to vector<2x1x32xf32>
    %73 = vector.extract_strided_slice %3 {offsets = [0, 0, 6], sizes = [2, 8, 1], strides = [1, 1, 1]} : vector<2x8x8xf32> to vector<2x8x1xf32>
    %74 = vector.broadcast %73 : vector<2x8x1xf32> to vector<2x8x32xf32>
    %75 = vector.broadcast %72 : vector<2x1x32xf32> to vector<2x8x32xf32>
    %76 = arith.mulf %74, %75 : vector<2x8x32xf32>
    %77 = arith.addf %66, %76 : vector<2x8x32xf32>
    %78 = vector.extract_strided_slice %4 {offsets = [0, 0, 6], sizes = [2, 8, 1], strides = [1, 1, 1]} : vector<2x8x8xf32> to vector<2x8x1xf32>
    %79 = vector.broadcast %78 : vector<2x8x1xf32> to vector<2x8x32xf32>
    %80 = vector.broadcast %72 : vector<2x1x32xf32> to vector<2x8x32xf32>
    %81 = arith.mulf %79, %80 : vector<2x8x32xf32>
    %82 = arith.addf %71, %81 : vector<2x8x32xf32>
    %83 = vector.extract_strided_slice %7 {offsets = [0, 7, 0], sizes = [2, 1, 32], strides = [1, 1, 1]} : vector<2x8x32xf32> to vector<2x1x32xf32>
    %84 = vector.extract_strided_slice %3 {offsets = [0, 0, 7], sizes = [2, 8, 1], strides = [1, 1, 1]} : vector<2x8x8xf32> to vector<2x8x1xf32>
    %85 = vector.broadcast %84 : vector<2x8x1xf32> to vector<2x8x32xf32>
    %86 = vector.broadcast %83 : vector<2x1x32xf32> to vector<2x8x32xf32>
    %87 = arith.mulf %85, %86 : vector<2x8x32xf32>
    %88 = arith.addf %77, %87 : vector<2x8x32xf32>
    %89 = vector.extract_strided_slice %4 {offsets = [0, 0, 7], sizes = [2, 8, 1], strides = [1, 1, 1]} : vector<2x8x8xf32> to vector<2x8x1xf32>
    %90 = vector.broadcast %89 : vector<2x8x1xf32> to vector<2x8x32xf32>
    %91 = vector.broadcast %83 : vector<2x1x32xf32> to vector<2x8x32xf32>
    %92 = arith.mulf %90, %91 : vector<2x8x32xf32>
    %93 = arith.addf %82, %92 : vector<2x8x32xf32>
    %94 = vector.shape_cast %88 : vector<2x8x32xf32> to vector<16x32xf32>
    %95 = vector.shape_cast %93 : vector<2x8x32xf32> to vector<16x32xf32>
    %96 = tpu.concatenate %94, %95, %6 in 1 : vector<16x32xf32>, vector<16x32xf32>, vector<16x32xf32> -> vector<16x96xf32>
    %cst = arith.constant dense<0.000000e+00> : vector<16x96xf32>
    %97 = tpu.matmul %96, %0, %cst {dimension_numbers = #tpu.dot_dimension_numbers<[1], [0], [0], [1], [0, 0, 1, 1], [], []>} : vector<16x96xf32>, vector<96x96xf32>, vector<16x96xf32> -> vector<16x96xf32>
    %98 = vector.broadcast %2 : vector<1x96xf32> to vector<16x96xf32>
    %99 = arith.addf %97, %98 : vector<16x96xf32>
    %100 = vector.extract_strided_slice %99 {offsets = [0, 0], sizes = [16, 32], strides = [1, 1]} : vector<16x96xf32> to vector<16x32xf32>
    %101 = arith.negf %100 : vector<16x32xf32>
    %102 = math.exp %101 : vector<16x32xf32>
    %cst_14 = arith.constant 1.000000e+00 : f32
    %103 = vector.broadcast %cst_14 : f32 to vector<16x32xf32>
    %104 = arith.addf %103, %102 : vector<16x32xf32>
    %105 = arith.divf %103, %104 : vector<16x32xf32>
    %106 = vector.extract_strided_slice %99 {offsets = [0, 32], sizes = [16, 32], strides = [1, 1]} : vector<16x96xf32> to vector<16x32xf32>
    %107 = arith.negf %106 : vector<16x32xf32>
    %108 = math.exp %107 : vector<16x32xf32>
    %cst_15 = arith.constant 1.000000e+00 : f32
    %109 = vector.broadcast %cst_15 : f32 to vector<16x32xf32>
    %110 = arith.addf %109, %108 : vector<16x32xf32>
    %111 = arith.divf %109, %110 : vector<16x32xf32>
    %112 = vector.extract_strided_slice %99 {offsets = [0, 64], sizes = [16, 32], strides = [1, 1]} : vector<16x96xf32> to vector<16x32xf32>
    %113 = arith.mulf %105, %6 : vector<16x32xf32>
    %cst_16 = arith.constant dense<0.000000e+00> : vector<16x32xf32>
    %114 = tpu.matmul %113, %1, %cst_16 {dimension_numbers = #tpu.dot_dimension_numbers<[1], [0], [0], [1], [0, 0, 1, 1], [], []>} : vector<16x32xf32>, vector<32x32xf32>, vector<16x32xf32> -> vector<16x32xf32>
    %115 = arith.addf %112, %114 : vector<16x32xf32>
    %116 = math.tanh %115 : vector<16x32xf32>
    %cst_17 = arith.constant 1.000000e+00 : f32
    %117 = vector.broadcast %cst_17 : f32 to vector<16x32xf32>
    %118 = arith.subf %117, %111 : vector<16x32xf32>
    %119 = arith.mulf %118, %6 : vector<16x32xf32>
    %120 = arith.mulf %111, %116 : vector<16x32xf32>
    %121 = arith.addf %119, %120 : vector<16x32xf32>
    %122 = vector.shape_cast %121 : vector<16x32xf32> to vector<2x8x32xf32>
    %123 = vector.extract_strided_slice %122 {offsets = [0, 0, 0], sizes = [2, 1, 32], strides = [1, 1, 1]} : vector<2x8x32xf32> to vector<2x1x32xf32>
    %124 = vector.extract_strided_slice %3 {offsets = [0, 0, 0], sizes = [2, 8, 1], strides = [1, 1, 1]} : vector<2x8x8xf32> to vector<2x8x1xf32>
    %125 = vector.broadcast %124 : vector<2x8x1xf32> to vector<2x8x32xf32>
    %126 = vector.broadcast %123 : vector<2x1x32xf32> to vector<2x8x32xf32>
    %127 = arith.mulf %125, %126 : vector<2x8x32xf32>
    %128 = vector.extract_strided_slice %4 {offsets = [0, 0, 0], sizes = [2, 8, 1], strides = [1, 1, 1]} : vector<2x8x8xf32> to vector<2x8x1xf32>
    %129 = vector.broadcast %128 : vector<2x8x1xf32> to vector<2x8x32xf32>
    %130 = vector.broadcast %123 : vector<2x1x32xf32> to vector<2x8x32xf32>
    %131 = arith.mulf %129, %130 : vector<2x8x32xf32>
    %132 = vector.extract_strided_slice %122 {offsets = [0, 1, 0], sizes = [2, 1, 32], strides = [1, 1, 1]} : vector<2x8x32xf32> to vector<2x1x32xf32>
    %133 = vector.extract_strided_slice %3 {offsets = [0, 0, 1], sizes = [2, 8, 1], strides = [1, 1, 1]} : vector<2x8x8xf32> to vector<2x8x1xf32>
    %134 = vector.broadcast %133 : vector<2x8x1xf32> to vector<2x8x32xf32>
    %135 = vector.broadcast %132 : vector<2x1x32xf32> to vector<2x8x32xf32>
    %136 = arith.mulf %134, %135 : vector<2x8x32xf32>
    %137 = arith.addf %127, %136 : vector<2x8x32xf32>
    %138 = vector.extract_strided_slice %4 {offsets = [0, 0, 1], sizes = [2, 8, 1], strides = [1, 1, 1]} : vector<2x8x8xf32> to vector<2x8x1xf32>
    %139 = vector.broadcast %138 : vector<2x8x1xf32> to vector<2x8x32xf32>
    %140 = vector.broadcast %132 : vector<2x1x32xf32> to vector<2x8x32xf32>
    %141 = arith.mulf %139, %140 : vector<2x8x32xf32>
    %142 = arith.addf %131, %141 : vector<2x8x32xf32>
    %143 = vector.extract_strided_slice %122 {offsets = [0, 2, 0], sizes = [2, 1, 32], strides = [1, 1, 1]} : vector<2x8x32xf32> to vector<2x1x32xf32>
    %144 = vector.extract_strided_slice %3 {offsets = [0, 0, 2], sizes = [2, 8, 1], strides = [1, 1, 1]} : vector<2x8x8xf32> to vector<2x8x1xf32>
    %145 = vector.broadcast %144 : vector<2x8x1xf32> to vector<2x8x32xf32>
    %146 = vector.broadcast %143 : vector<2x1x32xf32> to vector<2x8x32xf32>
    %147 = arith.mulf %145, %146 : vector<2x8x32xf32>
    %148 = arith.addf %137, %147 : vector<2x8x32xf32>
    %149 = vector.extract_strided_slice %4 {offsets = [0, 0, 2], sizes = [2, 8, 1], strides = [1, 1, 1]} : vector<2x8x8xf32> to vector<2x8x1xf32>
    %150 = vector.broadcast %149 : vector<2x8x1xf32> to vector<2x8x32xf32>
    %151 = vector.broadcast %143 : vector<2x1x32xf32> to vector<2x8x32xf32>
    %152 = arith.mulf %150, %151 : vector<2x8x32xf32>
    %153 = arith.addf %142, %152 : vector<2x8x32xf32>
    %154 = vector.extract_strided_slice %122 {offsets = [0, 3, 0], sizes = [2, 1, 32], strides = [1, 1, 1]} : vector<2x8x32xf32> to vector<2x1x32xf32>
    %155 = vector.extract_strided_slice %3 {offsets = [0, 0, 3], sizes = [2, 8, 1], strides = [1, 1, 1]} : vector<2x8x8xf32> to vector<2x8x1xf32>
    %156 = vector.broadcast %155 : vector<2x8x1xf32> to vector<2x8x32xf32>
    %157 = vector.broadcast %154 : vector<2x1x32xf32> to vector<2x8x32xf32>
    %158 = arith.mulf %156, %157 : vector<2x8x32xf32>
    %159 = arith.addf %148, %158 : vector<2x8x32xf32>
    %160 = vector.extract_strided_slice %4 {offsets = [0, 0, 3], sizes = [2, 8, 1], strides = [1, 1, 1]} : vector<2x8x8xf32> to vector<2x8x1xf32>
    %161 = vector.broadcast %160 : vector<2x8x1xf32> to vector<2x8x32xf32>
    %162 = vector.broadcast %154 : vector<2x1x32xf32> to vector<2x8x32xf32>
    %163 = arith.mulf %161, %162 : vector<2x8x32xf32>
    %164 = arith.addf %153, %163 : vector<2x8x32xf32>
    %165 = vector.extract_strided_slice %122 {offsets = [0, 4, 0], sizes = [2, 1, 32], strides = [1, 1, 1]} : vector<2x8x32xf32> to vector<2x1x32xf32>
    %166 = vector.extract_strided_slice %3 {offsets = [0, 0, 4], sizes = [2, 8, 1], strides = [1, 1, 1]} : vector<2x8x8xf32> to vector<2x8x1xf32>
    %167 = vector.broadcast %166 : vector<2x8x1xf32> to vector<2x8x32xf32>
    %168 = vector.broadcast %165 : vector<2x1x32xf32> to vector<2x8x32xf32>
    %169 = arith.mulf %167, %168 : vector<2x8x32xf32>
    %170 = arith.addf %159, %169 : vector<2x8x32xf32>
    %171 = vector.extract_strided_slice %4 {offsets = [0, 0, 4], sizes = [2, 8, 1], strides = [1, 1, 1]} : vector<2x8x8xf32> to vector<2x8x1xf32>
    %172 = vector.broadcast %171 : vector<2x8x1xf32> to vector<2x8x32xf32>
    %173 = vector.broadcast %165 : vector<2x1x32xf32> to vector<2x8x32xf32>
    %174 = arith.mulf %172, %173 : vector<2x8x32xf32>
    %175 = arith.addf %164, %174 : vector<2x8x32xf32>
    %176 = vector.extract_strided_slice %122 {offsets = [0, 5, 0], sizes = [2, 1, 32], strides = [1, 1, 1]} : vector<2x8x32xf32> to vector<2x1x32xf32>
    %177 = vector.extract_strided_slice %3 {offsets = [0, 0, 5], sizes = [2, 8, 1], strides = [1, 1, 1]} : vector<2x8x8xf32> to vector<2x8x1xf32>
    %178 = vector.broadcast %177 : vector<2x8x1xf32> to vector<2x8x32xf32>
    %179 = vector.broadcast %176 : vector<2x1x32xf32> to vector<2x8x32xf32>
    %180 = arith.mulf %178, %179 : vector<2x8x32xf32>
    %181 = arith.addf %170, %180 : vector<2x8x32xf32>
    %182 = vector.extract_strided_slice %4 {offsets = [0, 0, 5], sizes = [2, 8, 1], strides = [1, 1, 1]} : vector<2x8x8xf32> to vector<2x8x1xf32>
    %183 = vector.broadcast %182 : vector<2x8x1xf32> to vector<2x8x32xf32>
    %184 = vector.broadcast %176 : vector<2x1x32xf32> to vector<2x8x32xf32>
    %185 = arith.mulf %183, %184 : vector<2x8x32xf32>
    %186 = arith.addf %175, %185 : vector<2x8x32xf32>
    %187 = vector.extract_strided_slice %122 {offsets = [0, 6, 0], sizes = [2, 1, 32], strides = [1, 1, 1]} : vector<2x8x32xf32> to vector<2x1x32xf32>
    %188 = vector.extract_strided_slice %3 {offsets = [0, 0, 6], sizes = [2, 8, 1], strides = [1, 1, 1]} : vector<2x8x8xf32> to vector<2x8x1xf32>
    %189 = vector.broadcast %188 : vector<2x8x1xf32> to vector<2x8x32xf32>
    %190 = vector.broadcast %187 : vector<2x1x32xf32> to vector<2x8x32xf32>
    %191 = arith.mulf %189, %190 : vector<2x8x32xf32>
    %192 = arith.addf %181, %191 : vector<2x8x32xf32>
    %193 = vector.extract_strided_slice %4 {offsets = [0, 0, 6], sizes = [2, 8, 1], strides = [1, 1, 1]} : vector<2x8x8xf32> to vector<2x8x1xf32>
    %194 = vector.broadcast %193 : vector<2x8x1xf32> to vector<2x8x32xf32>
    %195 = vector.broadcast %187 : vector<2x1x32xf32> to vector<2x8x32xf32>
    %196 = arith.mulf %194, %195 : vector<2x8x32xf32>
    %197 = arith.addf %186, %196 : vector<2x8x32xf32>
    %198 = vector.extract_strided_slice %122 {offsets = [0, 7, 0], sizes = [2, 1, 32], strides = [1, 1, 1]} : vector<2x8x32xf32> to vector<2x1x32xf32>
    %199 = vector.extract_strided_slice %3 {offsets = [0, 0, 7], sizes = [2, 8, 1], strides = [1, 1, 1]} : vector<2x8x8xf32> to vector<2x8x1xf32>
    %200 = vector.broadcast %199 : vector<2x8x1xf32> to vector<2x8x32xf32>
    %201 = vector.broadcast %198 : vector<2x1x32xf32> to vector<2x8x32xf32>
    %202 = arith.mulf %200, %201 : vector<2x8x32xf32>
    %203 = arith.addf %192, %202 : vector<2x8x32xf32>
    %204 = vector.extract_strided_slice %4 {offsets = [0, 0, 7], sizes = [2, 8, 1], strides = [1, 1, 1]} : vector<2x8x8xf32> to vector<2x8x1xf32>
    %205 = vector.broadcast %204 : vector<2x8x1xf32> to vector<2x8x32xf32>
    %206 = vector.broadcast %198 : vector<2x1x32xf32> to vector<2x8x32xf32>
    %207 = arith.mulf %205, %206 : vector<2x8x32xf32>
    %208 = arith.addf %197, %207 : vector<2x8x32xf32>
    %209 = vector.shape_cast %203 : vector<2x8x32xf32> to vector<16x32xf32>
    %210 = vector.shape_cast %208 : vector<2x8x32xf32> to vector<16x32xf32>
    %211 = tpu.concatenate %209, %210, %121 in 1 : vector<16x32xf32>, vector<16x32xf32>, vector<16x32xf32> -> vector<16x96xf32>
    %cst_18 = arith.constant dense<0.000000e+00> : vector<16x96xf32>
    %212 = tpu.matmul %211, %0, %cst_18 {dimension_numbers = #tpu.dot_dimension_numbers<[1], [0], [0], [1], [0, 0, 1, 1], [], []>} : vector<16x96xf32>, vector<96x96xf32>, vector<16x96xf32> -> vector<16x96xf32>
    %213 = vector.broadcast %2 : vector<1x96xf32> to vector<16x96xf32>
    %214 = arith.addf %212, %213 : vector<16x96xf32>
    %215 = vector.extract_strided_slice %214 {offsets = [0, 0], sizes = [16, 32], strides = [1, 1]} : vector<16x96xf32> to vector<16x32xf32>
    %216 = arith.negf %215 : vector<16x32xf32>
    %217 = math.exp %216 : vector<16x32xf32>
    %cst_19 = arith.constant 1.000000e+00 : f32
    %218 = vector.broadcast %cst_19 : f32 to vector<16x32xf32>
    %219 = arith.addf %218, %217 : vector<16x32xf32>
    %220 = arith.divf %218, %219 : vector<16x32xf32>
    %221 = vector.extract_strided_slice %214 {offsets = [0, 32], sizes = [16, 32], strides = [1, 1]} : vector<16x96xf32> to vector<16x32xf32>
    %222 = arith.negf %221 : vector<16x32xf32>
    %223 = math.exp %222 : vector<16x32xf32>
    %cst_20 = arith.constant 1.000000e+00 : f32
    %224 = vector.broadcast %cst_20 : f32 to vector<16x32xf32>
    %225 = arith.addf %224, %223 : vector<16x32xf32>
    %226 = arith.divf %224, %225 : vector<16x32xf32>
    %227 = vector.extract_strided_slice %214 {offsets = [0, 64], sizes = [16, 32], strides = [1, 1]} : vector<16x96xf32> to vector<16x32xf32>
    %228 = arith.mulf %220, %121 : vector<16x32xf32>
    %cst_21 = arith.constant dense<0.000000e+00> : vector<16x32xf32>
    %229 = tpu.matmul %228, %1, %cst_21 {dimension_numbers = #tpu.dot_dimension_numbers<[1], [0], [0], [1], [0, 0, 1, 1], [], []>} : vector<16x32xf32>, vector<32x32xf32>, vector<16x32xf32> -> vector<16x32xf32>
    %230 = arith.addf %227, %229 : vector<16x32xf32>
    %231 = math.tanh %230 : vector<16x32xf32>
    %cst_22 = arith.constant 1.000000e+00 : f32
    %232 = vector.broadcast %cst_22 : f32 to vector<16x32xf32>
    %233 = arith.subf %232, %226 : vector<16x32xf32>
    %234 = arith.mulf %233, %121 : vector<16x32xf32>
    %235 = arith.mulf %226, %231 : vector<16x32xf32>
    %236 = arith.addf %234, %235 : vector<16x32xf32>
    %237 = vector.shape_cast %236 : vector<16x32xf32> to vector<2x8x32xf32>
    %c0_23 = arith.constant 0 : index
    %c0_24 = arith.constant 0 : index
    %c0_25 = arith.constant 0 : index
    %238 = vector.load %arg7[%c0_23, %c0_24, %c0_25] : memref<2x8x32xf32, #tpu.memory_space<vmem>>, vector<2x8x32xf32>
    tpu.vector_store %arg7[%c0_23, %c0_24, %c0_25], %237 {strides = array<i32>} : memref<2x8x32xf32, #tpu.memory_space<vmem>>, vector<2x8x32xf32>,
    return
  }
  func.func @transform_0(%arg0: i32) -> (i32, i32, i32) {
    %c0_i32 = arith.constant 0 : i32
    %c0_i32_0 = arith.constant 0 : i32
    %c0_i32_1 = arith.constant 0 : i32
    return %arg0, %c0_i32, %c0_i32_0 : i32, i32, i32
  }
  func.func @transform_1(%arg0: i32) -> (i32, i32, i32) {
    %c0_i32 = arith.constant 0 : i32
    %c0_i32_0 = arith.constant 0 : i32
    %c0_i32_1 = arith.constant 0 : i32
    return %arg0, %c0_i32, %c0_i32_0 : i32, i32, i32
  }
  func.func @transform_2(%arg0: i32) -> (i32, i32, i32) {
    %c0_i32 = arith.constant 0 : i32
    %c0_i32_0 = arith.constant 0 : i32
    %c0_i32_1 = arith.constant 0 : i32
    return %arg0, %c0_i32, %c0_i32_0 : i32, i32, i32
  }
  func.func @transform_3(%arg0: i32) -> (i32, i32) {
    %c0_i32 = arith.constant 0 : i32
    %c0_i32_0 = arith.constant 0 : i32
    %c0_i32_1 = arith.constant 0 : i32
    return %c0_i32, %c0_i32_0 : i32, i32
  }
  func.func @transform_4(%arg0: i32) -> (i32, i32) {
    %c0_i32 = arith.constant 0 : i32
    %c0_i32_0 = arith.constant 0 : i32
    %c0_i32_1 = arith.constant 0 : i32
    return %c0_i32, %c0_i32_0 : i32, i32
  }
  func.func @transform_5(%arg0: i32) -> (i32, i32) {
    %c0_i32 = arith.constant 0 : i32
    %c0_i32_0 = arith.constant 0 : i32
    %c0_i32_1 = arith.constant 0 : i32
    return %c0_i32, %c0_i32_0 : i32, i32
  }
  func.func @transform_6(%arg0: i32) -> (i32, i32, i32) {
    %c0_i32 = arith.constant 0 : i32
    %c0_i32_0 = arith.constant 0 : i32
    %c0_i32_1 = arith.constant 0 : i32
    return %arg0, %c0_i32, %c0_i32_0 : i32, i32, i32
  }
}

</mosaic_0001>

<bundles_post_ra>
// kernel: tpu_custom_call.1
= control target key start
LH: loop header
LB: loop body
LE: loop exit
PB: predicated region body
PF: predicated region fallthrough
CT: control target
= control target key end

     0   :  { %11 = vsyncpa [#allocation3], 0  ;;  %s1920_s0 = inlined_call_operand.hbm [shape: f32[2,8,8], index: 0, kind: input, shape index: {}]   ;;  %s1921_s1 = inlined_call_operand.hbm [shape: f32[2,8,8], index: 1, kind: input, shape index: {}]   ;;  %s1922_s2 = inlined_call_operand.hbm [shape: f32[2,8,32], index: 2, kind: input, shape index: {}]   ;;  %s1923_s3 = inlined_call_operand.hbm [shape: f32[96,96], index: 3, kind: input, shape index: {}]   ;;  %s1924_s4 = inlined_call_operand.hbm [shape: f32[32,32], index: 4, kind: input, shape index: {}]   ;;  %s1925_s5 = inlined_call_operand.vmem [shape: f32[1,96], index: 5, kind: input, shape index: {}]   ;;  %s1926_s6 = inlined_call_operand.hbm [shape: f32[2,8,32], index: 6, kind: output, shape index: {}]  }
   0x1   :  { %12 = vsyncpa [#allocation6], 0 }
   0x2   :  { %13 = vsyncpa [#allocation9], 0 }
   0x3   :  { %14 = vsyncpa [#allocation4], 0  ;;  %s1397_s21 = smov [#allocation5]   ;;  %s1398_s23 = smov [#allocation8]  }
   0x4   :  { %s32_s22 = sshll.u32 %s1397_s21, 4  ;;  %s56_s24 = sshll.u32 %s1398_s23, 4  ;;  %s33_s22 = int_to_ptr.vmem [resolvable:$true] %s32_s22  ;;  %s1451_s24 = int_to_ptr.vmem [resolvable:$true] %s56_s24 }
   0x5   :  { %s1257_s27 = scalar_lea.hbm %s1921_s1, 256 }
   0x6   :  { %p1258_p0 = scmp.ne.s32.totalorder %s1921_s1, %s1257_s27  ;;  %p1261_p1 = scmp.lt.u32.totalorder %s1257_s27, %s1921_s1 }
   0x8   :  { %p1263_p2 = pnand %p1261_p1, %p1258_p0 }
   0xa   :  { %1266 = shalt.err (!%p1263_p2)
}
   0xb   :  { %s1267_s8 = scalar_lea.vmem %s33_s22, 256  ;;  %p1272_p4 = scmp.lt.s32.totalorder %s33_s22, %s33_s22 }
   0xc   :  { %p1268_p3 = scmp.ne.s32.totalorder %s33_s22, %s1267_s8  ;;  %p1273_p5 = scmp.lt.s32.totalorder %s1267_s8, %s1267_s8 }
   0xe   :  { %p1274_p6 = por %p1273_p5, %p1272_p4 }
  0x10   :  { %p1275_p7 = pnand %p1274_p6, %p1268_p3 }
  0x12   :  { %1278 = shalt.err (!%p1275_p7)
}
  0x13   :  { %s1399_s9 = smov 128   ;;  %s1400_s10 = smov 8  }
  0x14   :  { %38 = dma.hbm_to_vmem [thread:$0]  %s1921_s1, 256, %s33_s22, [#allocation6], %s1399_s9, %s1399_s9, %s1400_s10  }
  0x15   :  { %s1279_s15 = scalar_lea.hbm %s1923_s3, 1536 }
  0x16   :  { %p1280_p8 = scmp.ne.s32.totalorder %s1923_s3, %s1279_s15  ;;  %p1283_p9 = scmp.lt.u32.totalorder %s1279_s15, %s1923_s3 }
  0x18   :  { %p1285_p10 = pnand %p1283_p9, %p1280_p8 }
  0x1a   :  { %1288 = shalt.err (!%p1285_p10)
}
  0x1b   :  { %s1289_s20 = scalar_lea.vmem %s1451_s24, 1536  ;;  %p1294_p12 = scmp.lt.s32.totalorder %s1451_s24, %s1451_s24 }
  0x1c   :  { %p1290_p11 = scmp.ne.s32.totalorder %s1451_s24, %s1289_s20  ;;  %p1295_p13 = scmp.lt.s32.totalorder %s1289_s20, %s1289_s20 }
  0x1e   :  { %p1296_p0 = por %p1295_p13, %p1294_p12 }
  0x20   :  { %p1297_p1 = pnand %p1296_p0, %p1290_p11 }
  0x22   :  { %1300 = shalt.err (!%p1297_p1)
}
  0x23   :  { %62 = dma.hbm_to_vmem [thread:$0]  %s1923_s3, 1536, %s1451_s24, [#allocation9], %s1399_s9, %s1399_s9, %s1400_s10  }
  0x24   :  { %s1401_s22 = smov [#allocation2]   ;;  %s1402_s25 = smov [#allocation7]  }
  0x25   :  { %s20_s23 = sshll.u32 %s1401_s22, 4  ;;  %s44_s26 = sshll.u32 %s1402_s25, 4  ;;  %s21_s23 = int_to_ptr.vmem [resolvable:$true] %s20_s23  ;;  %s1488_s26 = int_to_ptr.vmem [resolvable:$true] %s44_s26 }
  0x26   :  { %s1301_s29 = scalar_lea.hbm %s1920_s0, 256 }
  0x27   :  { %p1302_p2 = scmp.ne.s32.totalorder %s1920_s0, %s1301_s29  ;;  %p1305_p3 = scmp.lt.u32.totalorder %s1301_s29, %s1920_s0 }
  0x29   :  { %p1307_p4 = pnand %p1305_p3, %p1302_p2 }
  0x2b   :  { %1310 = shalt.err (!%p1307_p4)
}
  0x2c   :  { %s1311_s3 = scalar_lea.vmem %s21_s23, 256  ;;  %p1316_p6 = scmp.lt.s32.totalorder %s21_s23, %s21_s23 }
  0x2d   :  { %p1312_p5 = scmp.ne.s32.totalorder %s21_s23, %s1311_s3  ;;  %p1317_p7 = scmp.lt.s32.totalorder %s1311_s3, %s1311_s3 }
  0x2f   :  { %p1318_p8 = por %p1317_p7, %p1316_p6 }
  0x31   :  { %p1319_p9 = pnand %p1318_p8, %p1312_p5 }
  0x33   :  { %1322 = shalt.err (!%p1319_p9)
}
  0x34   :  { %26 = dma.hbm_to_vmem [thread:$0]  %s1920_s0, 256, %s21_s23, [#allocation3], %s1399_s9, %s1399_s9, %s1400_s10  }
  0x35   :  { %s1323_s15 = scalar_lea.hbm %s1922_s2, 256 }
  0x36   :  { %p1324_p10 = scmp.ne.s32.totalorder %s1922_s2, %s1323_s15  ;;  %p1327_p11 = scmp.lt.u32.totalorder %s1323_s15, %s1922_s2 }
  0x38   :  { %p1329_p12 = pnand %p1327_p11, %p1324_p10 }
  0x3a   :  { %1332 = shalt.err (!%p1329_p12)
}
  0x3b   :  { %s1333_s20 = scalar_lea.vmem %s1488_s26, 256  ;;  %p1338_p0 = scmp.lt.s32.totalorder %s1488_s26, %s1488_s26 }
  0x3c   :  { %p1334_p13 = scmp.ne.s32.totalorder %s1488_s26, %s1333_s20  ;;  %p1339_p1 = scmp.lt.s32.totalorder %s1333_s20, %s1333_s20 }
  0x3e   :  { %p1340_p2 = por %p1339_p1, %p1338_p0 }
  0x40   :  { %p1341_p3 = pnand %p1340_p2, %p1334_p13 }
  0x42   :  { %1344 = shalt.err (!%p1341_p3)
}
  0x43   :  { %50 = dma.hbm_to_vmem [thread:$0]  %s1922_s2, 256, %s1488_s26, [#allocation6], %s1399_s9, %s1399_s9, %s1400_s10  }
  0x44   :  { %s1403_s21 = smov [#allocation10]   ;;  %s1345_s27 = scalar_lea.hbm %s1924_s4, 512 }
  0x45   :  { %s68_s22 = sshll.u32 %s1403_s21, 4  ;;  %p1346_p4 = scmp.ne.s32.totalorder %s1924_s4, %s1345_s27  ;;  %s69_s22 = int_to_ptr.vmem [resolvable:$true] %s68_s22 }
  0x46   :  { %p1349_p5 = scmp.lt.u32.totalorder %s1345_s27, %s1924_s4 }
  0x48   :  { %p1351_p6 = pnand %p1349_p5, %p1346_p4 }
  0x4a   :  { %1354 = shalt.err (!%p1351_p6)
}
  0x4b   :  { %s1355_s8 = scalar_lea.vmem %s69_s22, 512  ;;  %p1360_p8 = scmp.lt.s32.totalorder %s69_s22, %s69_s22 }
  0x4c   :  { %p1356_p7 = scmp.ne.s32.totalorder %s69_s22, %s1355_s8  ;;  %p1361_p9 = scmp.lt.s32.totalorder %s1355_s8, %s1355_s8 }
  0x4e   :  { %p1362_p10 = por %p1361_p9, %p1360_p8 }
  0x50   :  { %p1363_p11 = pnand %p1362_p10, %p1356_p7 }
  0x52   :  { %1366 = shalt.err (!%p1363_p11)
}
  0x53   :  { %74 = dma.hbm_to_vmem [thread:$0]  %s1924_s4, 512, %s69_s22, [#allocation9], %s1399_s9, %s1399_s9, %s1400_s10  }
  0x54   :  { %1389 = dma.done.wait [#allocation3], 256  }
  0x55   :  { %1390 = vsyncadd [#allocation3], 4294967040 }
  0x56   :  { %1391 = dma.done.wait [#allocation6], 512  }
  0x57   :  { %1392 = vsyncadd [#allocation6], 4294966784 }
  0x58   :  { %1393 = dma.done.wait [#allocation9], 2048  }
  0x59   :  { %1394 = vsyncadd [#allocation9], 4294965248  ;;  %v1404_v0 = vmov 0   ;;  %v112_v1 = vld [vmem:[#allocation5 + $0x8] sm:$0xff]  ;;  %v111_v2 = vld [vmem:[#allocation5] sm:$0xff]  ;;  %v1405_v3 = vmov 1   ;;  %v125_v22 = vlaneseq }
  0x5a   :  { %1207 = vset.pattern.permute.xlu1 %v1404_v0  ;;  %1205 = vset.pattern.permute.xlu0 %v1404_v0  ;;  %v1406_v4 = vmov 2   ;;  %v1407_v5 = vmov 3   ;;  %v1408_v6 = vmov 4   ;;  %v1409_v7 = vmov 5   ;;  %v109_v9 = vld [vmem:[#allocation2] sm:$0xff]  ;;  %v110_v11 = vld [vmem:[#allocation2 + $0x8] sm:$0xff] }
  0x5b   :  { %142 = vperm.xlu1 %1207, %v112_v1   ;;  %137 = vperm.xlu0 %1205, %v111_v2   ;;  %v1410_v8 = vmov 7   ;;  %v1411_v10 = vmov 6   ;;  %v92_v12 = vld [vmem:[#allocation8] sm:$0xff]  ;;  %v93_v13 = vld [vmem:[#allocation8 + $0x8] sm:$0xff]  ;;  %v94_v14 = vld [vmem:[#allocation8 + $0x10] sm:$0xff]  ;;  %v126_v25 = vshrl.u32 %v125_v22, 7 }
  0x5c   :  { %v1540_v15 = vpack.c.bf16 %v93_v13, %v92_v12  ;;  %v95_v16 = vld [vmem:[#allocation8 + $0x18] sm:$0xff]  ;;  %v96_v18 = vld [vmem:[#allocation8 + $0x20] sm:$0xff]  ;;  %v97_v19 = vld [vmem:[#allocation8 + $0x28] sm:$0xff]  ;;  %s1412_s4 = smov 32   ;;  %s1413_s11 = smov 64   ;;  %vm387_vm0 = vcmask 261120  }
  0x5d   :  { %v1542_v17 = vpack.c.bf16 %v95_v16, %v94_v14  ;;  %v1547_v20 = vpack.c.bf16 %v97_v19, %v96_v18  ;;  %v1560_v27 = vld [vmem:[#allocation7] sm:$0xff]  ;;  %v1562_v28 = vsub.s32 0, %v126_v25  ;;  %v1564_v29 = vsub.s32 1, %v126_v25  ;;  %v1600_v43 = vld [vmem:[#allocation7 + $0x8] sm:$0xff]  ;;  %s1415_s12 = smov [#allocation11]  }
  0x5e   :  { %1123 = vmatprep.subr.bf16.mxu0 %v1540_v15  ;;  %v1576_v33 = vsub.s32 2, %v126_v25  ;;  %v1580_v35 = vsub.s32 3, %v126_v25  ;;  %v1598_v42 = vsub.s32 4, %v126_v25  ;;  %v1618_v51 = vsub.s32 5, %v126_v25  ;;  %v98_v52 = vld [vmem:[#allocation8 + $0x30] sm:$0xff]  ;;  %v99_v53 = vld [vmem:[#allocation8 + $0x38] sm:$0xff] }
  0x5f   :  { %1208 = vset.pattern.permute.xlu1 %v1405_v3  ;;  %1206 = vset.pattern.permute.xlu0 %v1405_v3  ;;  %v1570_v31 = vrot.slane %v1560_v27, %v1562_v28  ;;  %v1574_v32 = vrot.slane %v1560_v27, %v1564_v29  ;;  %v1606_v46 = vrot.slane %v1600_v43, %v1564_v29  ;;  %v1634_v59 = vsub.s32 6, %v126_v25  ;;  %v102_v18 = vld [vmem:[#allocation8 + $0x50] sm:$0xff]  ;;  %v103_v19 = vld [vmem:[#allocation8 + $0x58] sm:$0xff]  ;;  %s979_s13 = sshll.u32 %s1415_s12, 4  ;;  %s980_s13 = int_to_ptr.vmem [resolvable:$true] %s979_s13 }
  0x60   :  { %172 = vperm.xlu1 %1208, %v112_v1   ;;  %168 = vperm.xlu0 %1206, %v111_v2   ;;  %v1588_v38 = vrot.slane %v1560_v27, %v1576_v33  ;;  %v1596_v41 = vrot.slane %v1560_v27, %v1580_v35  ;;  %v1616_v50 = vrot.slane %v1560_v27, %v1598_v42  ;;  %v1636_v60 = vsub.s32 7, %v126_v25  ;;  %s1367_s14 = scalar_lea.vmem %s980_s13, 256  ;;  %p1372_p13 = scmp.lt.s32.totalorder %s980_s13, %s980_s13 }
  0x61   :  { %1125 = vmatpush3.bf16.msra.mxu0 %v1540_v15  ;;  %v1622_v54 = vrot.slane %v1600_v43, %v1562_v28  ;;  %v1626_v55 = vrot.slane %v1600_v43, %v1576_v33  ;;  %v1628_v56 = vpack.c.bf16 %v99_v53, %v98_v52  ;;  %v1632_v58 = vrot.slane %v1560_v27, %v1618_v51  ;;  %p1368_p12 = scmp.ne.s32.totalorder %s980_s13, %s1367_s14  ;;  %p1373_p0 = scmp.lt.s32.totalorder %s1367_s14, %s1367_s14 }
  0x62   :  { %1127 = vmatprep.subr.bf16.mxu0 %v1542_v17  ;;  %v1642_v62 = vrot.slane %v1600_v43, %v1580_v35  ;;  %vm390_vm1 = vcmask 523264   ;;  %vm399_vm2 = vcmask 785408  }
  0x63   :  { %p1374_p1 = por %p1373_p0, %p1372_p13 }
  0x64   :  { %1209 = vset.pattern.permute.xlu1 %v1406_v4  ;;  %1210 = vset.pattern.permute.xlu0 %v1406_v4 }
  0x65   :  { %200 = vperm.xlu1 %1209, %v111_v2   ;;  %204 = vperm.xlu0 %1210, %v112_v1   ;;  %p1375_p2 = pnand %p1374_p1, %p1368_p12 }
  0x66   :  { %1129 = vmatpush3.bf16.msra.mxu0 %v1542_v17 }
  0x67   :  { %1131 = vmatprep.subr.bf16.mxu0 %v1547_v20 }
  0x69   :  { %1211 = vset.pattern.permute.xlu1 %v1407_v5  ;;  %1212 = vset.pattern.permute.xlu0 %v1408_v6 }
  0x6a   :  { %232 = vperm.xlu1 %1211, %v111_v2   ;;  %264 = vperm.xlu0 %1212, %v111_v2  }
  0x6b   :  { %1133 = vmatpush3.bf16.msra.mxu0 %v1547_v20 }
  0x6c   :  { %1135 = vmatprep.subr.bf16.mxu0 %v1628_v56 }
  0x6e   :  { %236 = vperm.xlu1 %1211, %v112_v1   ;;  %1215 = vset.pattern.permute.xlu0 %v1409_v7 }
  0x6f   :  { %300 = vperm.xlu0 %1215, %v112_v1   ;;  %1137 = vmatpush3.bf16.msra.mxu0 %v1628_v56 }
  0x72   :  { %1213 = vset.pattern.permute.xlu1 %v1408_v6 }
  0x73   :  { %268 = vperm.xlu1 %1213, %v112_v1   ;;  %1217 = vset.pattern.permute.xlu0 %v1410_v8 }
  0x74   :  { %360 = vperm.xlu0 %1217, %v111_v2  }
  0x77   :  { %1214 = vset.pattern.permute.xlu1 %v1409_v7 }
  0x78   :  { %296 = vperm.xlu1 %1214, %v111_v2   ;;  %1220 = vset.pattern.permute.xlu0 %v1405_v3 }
  0x79   :  { %148 = vperm.xlu0 %1220, %v109_v9  }
  0x7c   :  { %1216 = vset.pattern.permute.xlu1 %v1411_v10 }
  0x7d   :  { %328 = vperm.xlu1 %1216, %v111_v2   ;;  %1222 = vset.pattern.permute.xlu0 %v1406_v4 }
  0x7e   :  { %180 = vperm.xlu0 %1222, %v109_v9  }
  0x81   :  { %332 = vperm.xlu1 %1216, %v112_v1  }
  0x82   :  { %1225 = vset.pattern.permute.xlu0 %v1407_v5 }
  0x83   :  { %216 = vperm.xlu0 %1225, %v110_v11  }
  0x85   :  { %1218 = vset.pattern.permute.xlu1 %v1410_v8 }
  0x86   :  { %364 = vperm.xlu1 %1218, %v112_v1  }
  0x87   :  { %1227 = vset.pattern.permute.xlu0 %v1409_v7 }
  0x88   :  { %276 = vperm.xlu0 %1227, %v109_v9  }
  0x8a   :  { %1219 = vset.pattern.permute.xlu1 %v1404_v0 }
  0x8b   :  { %117 = vperm.xlu1 %1219, %v109_v9  }
  0x8c   :  { %1230 = vset.pattern.permute.xlu0 %v1411_v10 }
  0x8d   :  { %312 = vperm.xlu0 %1230, %v110_v11  }
  0x8f   :  { %122 = vperm.xlu1 %1219, %v110_v11  }
  0x91   :  { %1232 = vset.pattern.permute.xlu0 %v1410_v8 }
  0x93   :  { %1221 = vset.pattern.permute.xlu1 %v1405_v3  ;;  %v100_v3 = vld [vmem:[#allocation8 + $0x40] sm:$0xff] }
  0x94   :  { %152 = vperm.xlu1 %1221, %v110_v11  }
  0x98   :  { %1223 = vset.pattern.permute.xlu1 %v1406_v4  ;;  %v101_v4 = vld [vmem:[#allocation8 + $0x48] sm:$0xff] }
  0x99   :  { %184 = vperm.xlu1 %1223, %v110_v11  }
  0x9d   :  { %1224 = vset.pattern.permute.xlu1 %v1407_v5 }
  0x9e   :  { %212 = vperm.xlu1 %1224, %v109_v9  }
  0xa2   :  { %1226 = vset.pattern.permute.xlu1 %v1408_v6 }
  0xa3   :  { %244 = vperm.xlu1 %1226, %v109_v9  }
  0xa7   :  { %248 = vperm.xlu1 %1226, %v110_v11  }
  0xab   :  { %1228 = vset.pattern.permute.xlu1 %v1409_v7  ;;  %v1658_v7 = vrot.slane %v1600_v43, %v1598_v42 }
  0xac   :  { %280 = vperm.xlu1 %1228, %v110_v11  }
  0xb0   :  { %1229 = vset.pattern.permute.xlu1 %v1411_v10  ;;  %v1666_v10 = vrot.slane %v1560_v27, %v1634_v59 }
  0xb1   :  { %308 = vperm.xlu1 %1229, %v109_v9  }
  0xb5   :  { %1231 = vset.pattern.permute.xlu1 %v1410_v8  ;;  %v1660_v8 = vpack.c.bf16 %v101_v4, %v100_v3 }
  0xb6   :  { %340 = vperm.xlu1 %1231, %v109_v9  }
  0xb7   :  { %1139 = vmatprep.subr.bf16.mxu0 %v1660_v8 }
  0xb8   :  { %1141 = vmatpush3.bf16.msra.mxu0 %v1660_v8 }
  0xba   :  { %344 = vperm.xlu1 %1231, %v110_v11   ;;  %v1670_v11 = vrot.slane %v1560_v27, %v1636_v60 }
  0xda   :  { %v1552_v21 = vpop.permute.xlu1 %142  ;;  %v1556_v24 = vpop.permute.xlu0 %137 }
  0xdb   :  { %v145_v36 = vmul.f32 %v1556_v24, %v1570_v31  ;;  %v146_v5 = vmul.f32 %v1552_v21, %v1622_v54 }
  0xdf   :  { %v1554_v23 = vpop.permute.xlu1 %172  ;;  %v1566_v30 = vpop.permute.xlu0 %168 }
  0xe0   :  { %v175_v37 = vmul.f32 %v1566_v30, %v1574_v32  ;;  %v176_v61 = vmul.f32 %v1554_v23, %v1606_v46 }
  0xe2   :  { %v177_v44 = vadd.f32 %v175_v37, %v145_v36  ;;  %v178_v12 = vadd.f32 %v176_v61, %v146_v5  ;;  %v290_v36 = vrot.slane %v1600_v43, %v1618_v51 }
  0xe4   :  { %v1558_v26 = vpop.permute.xlu1 %200  ;;  %v1592_v40 = vpop.permute.xlu0 %204 }
  0xe5   :  { %v207_v45 = vmul.f32 %v1558_v26, %v1588_v38  ;;  %v208_v6 = vmul.f32 %v1592_v40, %v1626_v55 }
  0xe7   :  { %v209_v57 = vadd.f32 %v207_v45, %v177_v44  ;;  %v210_v22 = vadd.f32 %v208_v6, %v178_v12  ;;  %v1684_v44 = vpack.c.bf16 %v103_v19, %v102_v18  ;;  %v354_v6 = vrot.slane %v1600_v43, %v1636_v60 }
  0xe9   :  { %v1578_v34 = vpop.permute.xlu1 %232  ;;  %v1608_v47 = vpop.permute.xlu0 %264  ;;  %1143 = vmatprep.subr.bf16.mxu0 %v1684_v44 }
  0xea   :  { %v239_v49 = vmul.f32 %v1578_v34, %v1596_v41  ;;  %v271_v1 = vmul.f32 %v1608_v47, %v1616_v50  ;;  %1145 = vmatpush3.bf16.msra.mxu0 %v1684_v44 }
  0xec   :  { %v241_v0 = vadd.f32 %v239_v49, %v209_v57  ;;  %v322_v57 = vrot.slane %v1600_v43, %v1634_v59 }
  0xed   :  { %v1590_v39 = vpop.permute.xlu1 %236 }
  0xee   :  { %v1644_v63 = vpop.permute.xlu0 %300  ;;  %v240_v13 = vmul.f32 %v1590_v39, %v1642_v62  ;;  %v273_v16 = vadd.f32 %v271_v1, %v241_v0 }
  0xef   :  { %v304_v1 = vmul.f32 %v1644_v63, %v290_v36 }
  0xf0   :  { %v242_v53 = vadd.f32 %v240_v13, %v210_v22 }
  0xf2   :  { %v1610_v48 = vpop.permute.xlu1 %268 }
  0xf3   :  { %v1674_v14 = vpop.permute.xlu0 %360  ;;  %v272_v25 = vmul.f32 %v1610_v48, %v1658_v7 }
  0xf4   :  { %v367_v52 = vmul.f32 %v1674_v14, %v1670_v11 }
  0xf5   :  { %v274_v0 = vadd.f32 %v272_v25, %v242_v53 }
  0xf7   :  { %v1649_v2 = vpop.permute.xlu1 %296 }
  0xf8   :  { %v303_v9 = vmul.f32 %v1649_v2, %v1632_v58  ;;  %v1701_v12 = vpop.permute.xlu0 %148 }
  0xf9   :  { %v163_v22 = vmul.f32 %v1574_v32, %v1701_v12 }
  0xfa   :  { %v305_v45 = vadd.f32 %v303_v9, %v273_v16  ;;  %v306_v9 = vadd.f32 %v304_v1, %v274_v0 }
  0xfc   :  { %v1682_v37 = vpop.permute.xlu1 %328 }
  0xfd   :  { %v335_v49 = vmul.f32 %v1682_v37, %v1666_v10 }
  0xff   :  { %v337_v61 = vadd.f32 %v335_v49, %v305_v45  ;;  %v1713_v45 = vpop.permute.xlu0 %180 }
 0x100   :  { %v1695_v3 = vpop.permute.xlu1 %332 }
 0x101   :  { %v369_v4 = vadd.f32 %v367_v52, %v337_v61  ;;  %v336_v5 = vmul.f32 %v1695_v3, %v322_v57  ;;  %v195_v52 = vmul.f32 %v1588_v38, %v1713_v45 }
 0x103   :  { %373 = vrot.lane.b32.xlu0 %v369_v4, %s1412_s4  ;;  %v338_v16 = vadd.f32 %v336_v5, %v306_v9  ;;  %v1731_v9 = vpop.permute.xlu0 %216 }
 0x105   :  { %v1703_v13 = vpop.permute.xlu1 %364 }
 0x106   :  { %1928 = vst [vmem:[#allocation16_spill] sm:$0xff] %v1703_v13  ;;  %v368_v18 = vmul.f32 %v1703_v13, %v354_v6 }
 0x107   :  { %381 = vrot.lane.b32.xlu0 %v1560_v27, %s1413_s11 }
 0x108   :  { %v370_v19 = vadd.f32 %v368_v18, %v338_v16  ;;  %v228_v16 = vmul.f32 %v1642_v62, %v1731_v9 }
 0x10a   :  { %375 = vrot.lane.b32.xlu1 %v370_v19, %s1412_s4  ;;  %v1711_v25 = vpop.permute.xlu1 %117 }
 0x10b   :  { %v133_v49 = vmul.f32 %v1570_v31, %v1711_v25 }
 0x10d   :  { %v165_v53 = vadd.f32 %v163_v22, %v133_v49 }
 0x10e   :  { %383 = vrot.lane.b32.xlu1 %v1600_v43, %s1413_s11  ;;  %v1721_v61 = vpop.permute.xlu1 %122 }
 0x10f   :  { %v197_v0 = vadd.f32 %v195_v52, %v165_v53  ;;  %v134_v32 = vmul.f32 %v1622_v54, %v1721_v61  ;;  %v1743_v52 = vpop.permute.xlu0 %276 }
 0x113   :  { %v1725_v1 = vpop.permute.xlu1 %152 }
 0x114   :  { %v164_v4 = vmul.f32 %v1606_v46, %v1725_v1 }
 0x116   :  { %v166_v5 = vadd.f32 %v164_v4, %v134_v32 }
 0x118   :  { %v1729_v31 = vpop.permute.xlu1 %184 }
 0x119   :  { %v196_v38 = vmul.f32 %v1626_v55, %v1729_v31  ;;  %v291_v55 = vmul.f32 %v1632_v58, %v1743_v52 }
 0x11b   :  { %v198_v18 = vadd.f32 %v196_v38, %v166_v5 }
 0x11d   :  { %v1737_v19 = vpop.permute.xlu1 %212  ;;  %v230_v54 = vadd.f32 %v228_v16, %v198_v18 }
 0x11e   :  { %v227_v22 = vmul.f32 %v1596_v41, %v1737_v19  ;;  %v1753_v41 = vpop.permute.xlu0 %312 }
 0x11f   :  { %v324_v18 = vmul.f32 %v322_v57, %v1753_v41 }
 0x120   :  { %v229_v49 = vadd.f32 %v227_v22, %v197_v0 }
 0x122   :  { %v1741_v46 = vpop.permute.xlu1 %244 }
 0x123   :  { %v259_v53 = vmul.f32 %v1616_v50, %v1741_v46 }
 0x125   :  { %v261_v32 = vadd.f32 %v259_v53, %v229_v49 }
 0x126   :  { %v1749_v62 = vpop.permute.xlu1 %248 }
 0x127   :  { %v260_v4 = vmul.f32 %v1658_v7, %v1749_v62  ;;  %v293_v5 = vadd.f32 %v291_v55, %v261_v32 }
 0x129   :  { %v262_v38 = vadd.f32 %v260_v4, %v230_v54 }
 0x12b   :  { %v1755_v0 = vpop.permute.xlu1 %280 }
 0x12c   :  { %v292_v16 = vmul.f32 %v290_v36, %v1755_v0 }
 0x12e   :  { %v294_v50 = vadd.f32 %v292_v16, %v262_v38 }
 0x130   :  { %v1759_v22 = vpop.permute.xlu1 %308  ;;  %v326_v58 = vadd.f32 %v324_v18, %v294_v50  ;;  %v105_v50 = vld [vmem:[#allocation10 + $0x8] sm:$0xff] }
 0x131   :  { %v323_v49 = vmul.f32 %v1666_v10, %v1759_v22 }
 0x133   :  { %v325_v53 = vadd.f32 %v323_v49, %v293_v5 }
 0x135   :  { %v1763_v13 = vpop.permute.xlu1 %340 }
 0x136   :  { %v355_v36 = vmul.f32 %v1670_v11, %v1763_v13  ;;  %v104_v11 = vld [vmem:[#allocation10] sm:$0xff] }
 0x137   :  { %v1146_v49 = vpack.c.bf16 %v105_v50, %v104_v11 }
 0x138   :  { %v357_v57 = vadd.f32 %v355_v36, %v325_v53  ;;  %v107_v53 = vld [vmem:[#allocation10 + $0x18] sm:$0xff] }
 0x139   :  { %v1765_v7 = vpop.permute.xlu1 %344  ;;  %1147 = vmatprep.subr.bf16.mxu1 %v1146_v49  ;;  %1179 = vmatprep.subr.bf16.mxu0 %v1146_v49 }
 0x13a   :  { %v356_v54 = vmul.f32 %v354_v6, %v1765_v7  ;;  %1149 = vmatpush3.bf16.msra.mxu1 %v1146_v49 }
 0x13c   :  { %v358_v55 = vadd.f32 %v356_v54, %v326_v58  ;;  %v106_v58 = vld [vmem:[#allocation10 + $0x10] sm:$0xff] }
 0x13d   :  { %v1150_v54 = vpack.c.bf16 %v107_v53, %v106_v58 }
 0x13f   :  { %1151 = vmatprep.subr.bf16.mxu1 %v1150_v54 }
 0x140   :  { %1153 = vmatpush3.bf16.msra.mxu1 %v1150_v54 }
 0x141   :  { %1155 = vmatprep.subr.bf16.mxu1 %v1540_v15 }
 0x175   :  { %v374_v32 = vpop.permute.xlu0 %373 }
 0x176   :  { %v388_v4 = vsel %vm387_vm0, %v357_v57, %v374_v32 }
 0x179   :  { %v382_v38 = vpop.permute.xlu0 %381 }
 0x17a   :  { %v391_v10 = vsel %vm390_vm1, %v388_v4, %v382_v38 }
 0x17b   :  { %1070 = vmatprep.mubr.msk.f32.mxu0 %vm399_vm2, %v391_v10 }
 0x17c   :  { %v376_v5 = vpop.permute.xlu1 %375 }
 0x17d   :  { %v389_v16 = vsel %vm387_vm0, %v358_v55, %v376_v5  ;;  %v1780_v55 = vld [vmem:[%s1925_s5] ss:$0 sm:$0xff]  ;;  %s1414_s5 = smov 96  }
 0x180   :  { %v384_v6 = vpop.permute.xlu1 %383 }
 0x181   :  { %v392_v18 = vsel %vm390_vm1, %v389_v16, %v384_v6 }
 0x182   :  { %1071 = vmatmul.mubr.msk.f32.vlgmr.msra.gmra.mrb[0].mxu0 %vm399_vm2, %v392_v18 }
 0x183   :  { %1181 = vmatpush3.bf16.msra.mxu0 %v1146_v49 }
 0x184   :  { %1183 = vmatprep.subr.bf16.mxu0 %v1150_v54 }
 0x187   :  { %1185 = vmatpush3.bf16.msra.mxu0 %v1150_v54 }
 0x255   :  { %v1072_v36 = vpop.f32.mrb[0].mxu0 }
 0x256   :  { %v478_v32 = vadd.f32 %v1072_v36, %v1780_v55  ;;  %v472_v57 = vpop.f32.mrb[1].mxu0 }
 0x257   :  { %v473_v4 = vadd.f32 %v1780_v55, %v472_v57 }
 0x258   :  { %v997_v38 = vmul.f32 -1.442695, %v478_v32 }
 0x259   :  { %v996_v10 = vmul.f32 -1.442695, %v473_v4 }
 0x25a   :  { %1233 = vpow2.f32 %v997_v38 }
 0x25b   :  { %1235 = vpow2.f32 %v996_v10 }
 0x264   :  { %v1234_v5 = vpop.eup %1233 }
 0x265   :  { %v1236_v16 = vpop.eup %1235  ;;  %v488_v6 = vadd.f32 1.0, %v1234_v5 }
 0x266   :  { %v487_v18 = vadd.f32 1.0, %v1236_v16 }
 0x267   :  { %1237 = vrcp.f32 %v488_v6 }
 0x268   :  { %1239 = vrcp.f32 %v487_v18 }
 0x271   :  { %v1238_v11 = vpop.eup %1237 }
 0x272   :  { %v1240_v50 = vpop.eup %1239  ;;  %v494_v49 = vmul.f32 %v1238_v11, %v1600_v43 }
 0x273   :  { %v493_v58 = vmul.f32 %v1240_v50, %v1560_v27  ;;  %v588_v57 = vsub.f32 1.0, %v1240_v50 }
 0x275   :  { %1081 = vmatprep.mubr.msk.f32.mxu1 %vm387_vm0, %v493_v58 }
 0x276   :  { %1082 = vmatmul.mubr.msk.f32.vlgmr.msra.gmra.mrb[0].mxu1 %vm387_vm0, %v494_v49 }
 0x277   :  { %1157 = vmatpush3.bf16.msra.mxu1 %v1540_v15 }
 0x278   :  { %1159 = vmatprep.subr.bf16.mxu1 %v1542_v17 }
 0x27b   :  { %1161 = vmatpush3.bf16.msra.mxu1 %v1542_v17 }
 0x27c   :  { %1163 = vmatprep.subr.bf16.mxu1 %v1547_v20 }
 0x27f   :  { %1165 = vmatpush3.bf16.msra.mxu1 %v1547_v20 }
 0x280   :  { %1167 = vmatprep.subr.bf16.mxu1 %v1628_v56 }
 0x283   :  { %1169 = vmatpush3.bf16.msra.mxu1 %v1628_v56 }
 0x284   :  { %1171 = vmatprep.subr.bf16.mxu1 %v1660_v8 }
 0x287   :  { %1173 = vmatpush3.bf16.msra.mxu1 %v1660_v8 }
 0x288   :  { %1175 = vmatprep.subr.bf16.mxu1 %v1684_v44 }
 0x28b   :  { %1177 = vmatpush3.bf16.msra.mxu1 %v1684_v44 }
 0x349   :  { %v1083_v15 = vpop.f32.mrb[0].mxu1 }
 0x34a   :  { %580 = vrot.lane.b32.xlu1 %v1083_v15, %s1413_s11  ;;  %v567_v17 = vpop.f32.mrb[1].mxu1 }
 0x34b   :  { %578 = vrot.lane.b32.xlu0 %v567_v17, %s1413_s11 }
 0x34f   :  { %590 = vrot.lane.b32.xlu0 %v1560_v27, %s1412_s4 }
 0x353   :  { %592 = vrot.lane.b32.xlu0 %v1600_v43, %s1412_s4  ;;  %v589_v43 = vsub.f32 1.0, %v1238_v11 }
 0x3bc   :  { %v581_v20 = vpop.permute.xlu1 %580 }
 0x3bd   :  { %v579_v56 = vpop.permute.xlu0 %578  ;;  %v585_v8 = vadd.f32 %v581_v20, %v478_v32 }
 0x3be   :  { %v584_v53 = vadd.f32 %v579_v56, %v473_v4 }
 0x3c0   :  { %1241 = vtanh.f32 %v584_v53 }
 0x3c1   :  { %1243 = vtanh.f32 %v585_v8  ;;  %v591_v36 = vpop.permute.xlu0 %590 }
 0x3c2   :  { %v596_v27 = vmul.f32 %v591_v36, %v588_v57 }
 0x3c5   :  { %v593_v10 = vpop.permute.xlu0 %592 }
 0x3c6   :  { %v597_v4 = vmul.f32 %v593_v10, %v589_v43 }
 0x3ca   :  { %v1242_v54 = vpop.eup %1241 }
 0x3cb   :  { %600 = vrot.lane.b32.xlu1 %v1242_v54, %s1414_s5  ;;  %v1244_v44 = vpop.eup %1243 }
 0x3cf   :  { %602 = vrot.lane.b32.xlu1 %v1244_v44, %s1414_s5 }
 0x43d   :  { %v601_v38 = vpop.permute.xlu1 %600 }
 0x43e   :  { %v606_v5 = vmul.f32 %v1240_v50, %v601_v38 }
 0x440   :  { %v1807_v16 = vadd.f32 %v606_v5, %v596_v27 }
 0x441   :  { %v603_v32 = vpop.permute.xlu1 %602 }
 0x442   :  { %v607_v6 = vmul.f32 %v1238_v11, %v603_v32  ;;  %v613_v18 = vrot.slane %v1807_v16, %v1562_v28  ;;  %v625_v58 = vrot.slane %v1807_v16, %v1564_v29  ;;  %v641_v49 = vrot.slane %v1807_v16, %v1576_v33 }
 0x443   :  { %v657_v15 = vrot.slane %v1807_v16, %v1580_v35  ;;  %v673_v11 = vrot.slane %v1807_v16, %v1598_v42  ;;  %v689_v36 = vrot.slane %v1807_v16, %v1618_v51 }
 0x444   :  { %v1817_v17 = vadd.f32 %v607_v6, %v597_v4  ;;  %v618_v50 = vmul.f32 %v613_v18, %v1711_v25  ;;  %v630_v20 = vmul.f32 %v625_v58, %v1701_v12  ;;  %v646_v53 = vmul.f32 %v641_v49, %v1713_v45 }
 0x445   :  { %v662_v44 = vmul.f32 %v657_v15, %v1737_v19  ;;  %v678_v27 = vmul.f32 %v673_v11, %v1741_v46  ;;  %v694_v5 = vmul.f32 %v689_v36, %v1743_v52  ;;  %v650_v52 = vmul.f32 %v641_v49, %v1558_v26 }
 0x446   :  { %v632_v56 = vadd.f32 %v630_v20, %v618_v50  ;;  %v617_v8 = vrot.slane %v1817_v17, %v1562_v28  ;;  %v629_v54 = vrot.slane %v1817_v17, %v1564_v29  ;;  %v645_v12 = vrot.slane %v1817_v17, %v1576_v33 }
 0x447   :  { %v661_v45 = vrot.slane %v1817_v17, %v1580_v35  ;;  %v705_v28 = vrot.slane %v1807_v16, %v1634_v59  ;;  %v677_v29 = vrot.slane %v1817_v17, %v1598_v42  ;;  %v634_v35 = vmul.f32 %v625_v58, %v1566_v30 }
 0x448   :  { %v648_v25 = vadd.f32 %v646_v53, %v632_v56  ;;  %v619_v57 = vmul.f32 %v617_v8, %v1721_v61  ;;  %v631_v38 = vmul.f32 %v629_v54, %v1725_v1  ;;  %v647_v33 = vmul.f32 %v645_v12, %v1729_v31 }
 0x449   :  { %v721_v61 = vrot.slane %v1807_v16, %v1636_v60  ;;  %v620_v1 = vmul.f32 %v613_v18, %v1556_v24  ;;  %v663_v32 = vmul.f32 %v661_v45, %v1731_v9  ;;  %v693_v42 = vrot.slane %v1817_v17, %v1618_v51 }
 0x44a   :  { %v664_v19 = vadd.f32 %v662_v44, %v648_v25  ;;  %v633_v10 = vadd.f32 %v631_v38, %v619_v57  ;;  %v710_v46 = vmul.f32 %v705_v28, %v1759_v22  ;;  %v679_v31 = vmul.f32 %v677_v29, %v1749_v62 }
 0x44b   :  { %v636_v6 = vadd.f32 %v634_v35, %v620_v1  ;;  %v709_v24 = vrot.slane %v1817_v17, %v1634_v59  ;;  %v621_v30 = vmul.f32 %v617_v8, %v1552_v21  ;;  %v726_v18 = vmul.f32 %v721_v61, %v1763_v13 }
 0x44c   :  { %v680_v43 = vadd.f32 %v678_v27, %v664_v19  ;;  %v649_v4 = vadd.f32 %v647_v33, %v633_v10  ;;  %v666_v58 = vmul.f32 %v657_v15, %v1578_v34  ;;  %v635_v51 = vmul.f32 %v629_v54, %v1554_v23 }
 0x44d   :  { %v652_v9 = vadd.f32 %v650_v52, %v636_v6  ;;  %v695_v62 = vmul.f32 %v693_v42, %v1755_v0  ;;  %v725_v26 = vrot.slane %v1817_v17, %v1636_v60  ;;  %v682_v53 = vmul.f32 %v673_v11, %v1608_v47 }
 0x44e   :  { %v696_v50 = vadd.f32 %v694_v5, %v680_v43  ;;  %v665_v20 = vadd.f32 %v663_v32, %v649_v4  ;;  %v637_v59 = vadd.f32 %v635_v51, %v621_v30  ;;  %v651_v21 = vmul.f32 %v645_v12, %v1592_v40 }
 0x44f   :  { %v668_v49 = vadd.f32 %v666_v58, %v652_v9  ;;  %v711_v44 = vmul.f32 %v709_v24, %v1753_v41  ;;  %v698_v23 = vmul.f32 %v689_v36, %v1649_v2  ;;  %v667_v54 = vmul.f32 %v661_v45, %v1590_v39  ;;  %v1929_v45 = vld [vmem:[#allocation16_spill] sm:$0xff] }
 0x450   :  { %v712_v22 = vadd.f32 %v710_v46, %v696_v50  ;;  %v681_v56 = vadd.f32 %v679_v31, %v665_v20  ;;  %v653_v15 = vadd.f32 %v651_v21, %v637_v59  ;;  %v727_v60 = vmul.f32 %v725_v26, %v1765_v7 }
 0x451   :  { %v684_v34 = vadd.f32 %v682_v53, %v668_v49  ;;  %v714_v47 = vmul.f32 %v705_v28, %v1682_v37  ;;  %v683_v40 = vmul.f32 %v677_v29, %v1610_v48  ;;  %v730_v41 = vmul.f32 %v721_v61, %v1674_v14 }
 0x452   :  { %v728_v8 = vadd.f32 %v726_v18, %v712_v22  ;;  %v697_v13 = vadd.f32 %v695_v62, %v681_v56  ;;  %v669_v11 = vadd.f32 %v667_v54, %v653_v15  ;;  %v699_v2 = vmul.f32 %v693_v42, %v1644_v63 }
 0x453   :  { %v700_v25 = vadd.f32 %v698_v23, %v684_v34  ;;  %v715_v36 = vmul.f32 %v709_v24, %v1695_v3  ;;  %v731_v28 = vmul.f32 %v725_v26, %v1929_v45 }
 0x454   :  { %736 = vrot.lane.b32.xlu0 %v728_v8, %s1414_s5  ;;  %v713_v0 = vadd.f32 %v711_v44, %v697_v13  ;;  %v685_v38 = vadd.f32 %v683_v40, %v669_v11 }
 0x455   :  { %v716_v57 = vadd.f32 %v714_v47, %v700_v25 }
 0x456   :  { %v729_v12 = vadd.f32 %v727_v60, %v713_v0  ;;  %v701_v7 = vadd.f32 %v699_v2, %v685_v38 }
 0x457   :  { %v732_v39 = vadd.f32 %v730_v41, %v716_v57 }
 0x458   :  { %744 = vrot.lane.b32.xlu0 %v1807_v16, %s1412_s4  ;;  %738 = vrot.lane.b32.xlu1 %v729_v12, %s1414_s5  ;;  %v717_v37 = vadd.f32 %v715_v36, %v701_v7 }
 0x45a   :  { %v733_v48 = vadd.f32 %v731_v28, %v717_v37 }
 0x45c   :  { %847 = vrot.lane.b32.xlu0 %v1807_v16, %s1414_s5  ;;  %746 = vrot.lane.b32.xlu1 %v1817_v17, %s1412_s4 }
 0x460   :  { %849 = vrot.lane.b32.xlu1 %v1817_v17, %s1414_s5 }
 0x4c6   :  { %v737_v63 = vpop.permute.xlu0 %736 }
 0x4c7   :  { %v750_v14 = vsel %vm387_vm0, %v737_v63, %v732_v39 }
 0x4ca   :  { %v739_v29 = vpop.permute.xlu1 %738  ;;  %v745_v19 = vpop.permute.xlu0 %744 }
 0x4cb   :  { %v752_v3 = vsel %vm390_vm1, %v750_v14, %v745_v19  ;;  %v751_v27 = vsel %vm387_vm0, %v739_v29, %v733_v48 }
 0x4cc   :  { %1108 = vmatprep.mubr.msk.f32.mxu1 %vm399_vm2, %v752_v3 }
 0x4ce   :  { %v747_v10 = vpop.permute.xlu1 %746  ;;  %v848_v50 = vpop.permute.xlu0 %847 }
 0x4cf   :  { %v753_v33 = vsel %vm390_vm1, %v751_v27, %v747_v10 }
 0x4d0   :  { %1109 = vmatmul.mubr.msk.f32.vlgmr.msra.gmra.mrb[2].mxu1 %vm399_vm2, %v753_v33 }
 0x4d2   :  { %v850_v20 = vpop.permute.xlu1 %849 }
 0x5a3   :  { %v1110_v5 = vpop.f32.mrb[2].mxu1 }
 0x5a4   :  { %v832_v61 = vadd.f32 %v1110_v5, %v1780_v55  ;;  %v826_v1 = vpop.f32.mrb[3].mxu1 }
 0x5a5   :  { %v827_v35 = vadd.f32 %v1780_v55, %v826_v1 }
 0x5a6   :  { %v1003_v43 = vmul.f32 -1.442695, %v832_v61 }
 0x5a7   :  { %v1002_v4 = vmul.f32 -1.442695, %v827_v35 }
 0x5a8   :  { %1245 = vpow2.f32 %v1003_v43 }
 0x5a9   :  { %1247 = vpow2.f32 %v1002_v4 }
 0x5b2   :  { %v1246_v32 = vpop.eup %1245 }
 0x5b3   :  { %v1248_v42 = vpop.eup %1247  ;;  %v842_v46 = vadd.f32 1.0, %v1246_v32 }
 0x5b4   :  { %v841_v31 = vadd.f32 1.0, %v1248_v42 }
 0x5b5   :  { %1249 = vrcp.f32 %v842_v46 }
 0x5b6   :  { %1251 = vrcp.f32 %v841_v31 }
 0x5bf   :  { %v1250_v6 = vpop.eup %1249 }
 0x5c0   :  { %v1252_v52 = vpop.eup %1251  ;;  %v854_v30 = vmul.f32 %v1250_v6, %v850_v20  ;;  %v949_v26 = vsub.f32 1.0, %v1250_v6 }
 0x5c1   :  { %v853_v24 = vmul.f32 %v1252_v52, %v848_v50  ;;  %v948_v49 = vsub.f32 1.0, %v1252_v52 }
 0x5c2   :  { %v951_v59 = vmul.f32 %v949_v26, %v1817_v17 }
 0x5c3   :  { %1119 = vmatprep.mubr.msk.f32.mxu0 %vm387_vm0, %v853_v24  ;;  %v950_v13 = vmul.f32 %v948_v49, %v1807_v16 }
 0x5c4   :  { %1120 = vmatmul.mubr.msk.f32.vlgmr.msra.gmra.mrb[2].mxu0 %vm387_vm0, %v854_v30 }
 0x697   :  { %v1121_v55 = vpop.f32.mrb[2].mxu0 }
 0x698   :  { %940 = vrot.lane.b32.xlu1 %v1121_v55, %s1413_s11  ;;  %v927_v18 = vpop.f32.mrb[3].mxu0 }
 0x699   :  { %938 = vrot.lane.b32.xlu0 %v927_v18, %s1413_s11 }
 0x70a   :  { %v941_v9 = vpop.permute.xlu1 %940 }
 0x70b   :  { %v945_v58 = vadd.f32 %v941_v9, %v832_v61  ;;  %v939_v51 = vpop.permute.xlu0 %938 }
 0x70c   :  { %v944_v22 = vadd.f32 %v939_v51, %v827_v35 }
 0x70d   :  { %1253 = vtanh.f32 %v945_v58 }
 0x70e   :  { %1255 = vtanh.f32 %v944_v22 }
 0x717   :  { %v1254_v56 = vpop.eup %1253 }
 0x718   :  { %v1256_v62 = vpop.eup %1255  ;;  %956 = vrot.lane.b32.xlu1 %v1254_v56, %s1414_s5 }
 0x719   :  { %954 = vrot.lane.b32.xlu0 %v1256_v62, %s1414_s5 }
 0x78a   :  { %v957_v53 = vpop.permute.xlu1 %956 }
 0x78b   :  { %v961_v21 = vmul.f32 %v1250_v6, %v957_v53  ;;  %v955_v8 = vpop.permute.xlu0 %954 }
 0x78c   :  { %v960_v44 = vmul.f32 %v1252_v52, %v955_v8 }
 0x78d   :  { %v963_v34 = vadd.f32 %v961_v21, %v951_v59 }
 0x78e   :  { %v962_v23 = vadd.f32 %v960_v44, %v950_v13 }
 0x78f   :  { %968 = vrot.lane.b32.xlu1 %v963_v34, %s1414_s5 }
 0x790   :  { %966 = vrot.lane.b32.xlu0 %v962_v23, %s1414_s5 }
 0x801   :  { %v969_v15 = vpop.permute.xlu1 %968 }
 0x802   :  { %973 = vst.msk [vmem:[#allocation11 + $0x8] sm:$0xff] %vm387_vm0, %v969_v15  ;;  %v967_v54 = vpop.permute.xlu0 %966 }
 0x803   :  { %972 = vst.msk [vmem:[#allocation11] sm:$0xff] %vm387_vm0, %v967_v54 }
 0x804   :  { %1378 = shalt.err (!%p1375_p2)
}
 0x805   :  { %s1379_s17 = scalar_lea.hbm %s1926_s6, 256 }
 0x806   :  { %p1380_p3 = scmp.ne.s32.totalorder %s1926_s6, %s1379_s17  ;;  %p1383_p4 = scmp.lt.u32.totalorder %s1379_s17, %s1926_s6 }
 0x808   :  { %p1385_p5 = pnand %p1383_p4, %p1380_p3 }
 0x80a   :  { %1388 = shalt.err (!%p1385_p5)
}
 0x80b   :  { %985 = dma.vmem_to_hbm [thread:$0]  %s980_s13, 256, %s1926_s6, [#allocation4], %s1399_s9, %s1399_s9, %s1400_s10  }
 0x80c   :  { %1395 = dma.done.wait [#allocation4], 256  }
 0x80d   :  { %1396 = vsyncadd [#allocation4], 4294967040 }
 0x80e   :  { %989 = vsyncpa [#allocation3], 1 }
 0x80f   :  { %990 = vsyncpa [#allocation6], 1 }
 0x810   :  { %991 = vsyncpa [#allocation9], 1 }
 0x811   :  { %992 = vsyncpa [#allocation4], 1 }

</bundles_post_ra>
